<compile_context>
chip_gen: v5e
topology: v5e:2x2
jax: 0.10.0
libtpu: 0.0.40
codegen_flags: <defaults>
</compile_context>

<pallas_src>
import functools

import jax
import jax.numpy as jnp
from jax import lax
from jax.experimental import pallas as pl
from jax.experimental.pallas import tpu as pltpu


LANE = 128
TR_MAX = 8192                  # max lane-tile width (output columns per grid step)
IN_BLOCK_BYTES = 6 * 2 ** 20   # budget for one (K, tr) bf16 patch block


def _round_up(x, m):
    return -(-x // m) * m


def _choose_lane_tile(kdim, r):
    """Lane tile width + padded column count for a (Cout,K)@(K,R) matmul."""
    cap = (IN_BLOCK_BYTES // (kdim * 2)) // LANE * LANE
    cap = max(LANE, min(TR_MAX, cap))
    rpad = _round_up(r, LANE)
    # aim for >= 2 grid steps when possible so v7x megacore can split the work
    half = _round_up(max(rpad // 2, 1), LANE)
    tr = max(LANE, min(cap, half))
    grid = -(-rpad // tr)
    return tr, grid * tr


# ----------------------------------------------------------------------------
# Pallas kernel: one lane-dense matmul + bias + (optional) ReLU per column tile
# ----------------------------------------------------------------------------
def _matmul_bias_act_kernel(w_ref, p_ref, b_ref, o_ref, *, relu):
    # w_ref: (Cout, K) bf16   p_ref: (K, tr) bf16   b_ref: (Cout, 1) f32
    # o_ref: (Cout, tr) f32
    acc = jnp.dot(w_ref[...], p_ref[...], preferred_element_type=jnp.float32)
    acc = acc + b_ref[...]
    if relu:
        acc = jnp.maximum(acc, 0.0)
    o_ref[...] = acc.astype(o_ref.dtype)


def _matmul_cols(wf, p, bias, *, relu):
    """(Cout, K) @ (K, R) + bias (+ReLU).  Returns lane-dense (Cout, R) f32."""
    cout, kdim = wf.shape
    r = p.shape[1]
    tr, rpad = _choose_lane_tile(kdim, r)
    if rpad != r:
        p = jnp.pad(p, ((0, 0), (0, rpad - r)))
    grid = (rpad // tr,)
    out = pl.pallas_call(
        functools.partial(_matmul_bias_act_kernel, relu=relu),
        out_shape=jax.ShapeDtypeStruct((cout, rpad), jnp.float32),
        grid_spec=pltpu.PrefetchScalarGridSpec(
            num_scalar_prefetch=0,
            grid=grid,
            in_specs=[
                pl.BlockSpec((cout, kdim), lambda i: (0, 0)),  # folded weights (resident)
                pl.BlockSpec((kdim, tr), lambda i: (0, i)),    # patch columns (pipelined)
                pl.BlockSpec((cout, 1), lambda i: (0, 0)),     # bias (resident)
            ],
            out_specs=pl.BlockSpec((cout, tr), lambda i: (0, i)),
        ),
        compiler_params=pltpu.CompilerParams(
            dimension_semantics=("parallel",),
            vmem_limit_bytes=40 * 2 ** 20,
        ),
    )(wf.astype(jnp.bfloat16), p.astype(jnp.bfloat16),
      bias.reshape(cout, 1).astype(jnp.float32))
    return out[:, :r]


# ----------------------------------------------------------------------------
# Conv3d / ConvTranspose3d wrappers (pad / slice / reshape glue only)
# ----------------------------------------------------------------------------
def conv3d_pallas(x, w, b, *, padding, dilation=1, stride=1, relu=True):
    """x: (N,Cin,D,H,W) f32; w: (Cout,Cin,K,K,K) (PyTorch layout); b: (Cout,)."""
    n, cin, d, h, wsz = x.shape
    cout, k = w.shape[0], w.shape[2]
    xp = jnp.pad(x, ((0, 0), (0, 0)) + ((padding, padding),) * 3).astype(jnp.bfloat16)

    if stride == 2:
        # Only used with K=3, dilation=2, padding=2: every tap offset is even,
        # so the strided conv reads only the even phase of the padded input.
        assert dilation == 2 and k == 3 and padding == 2
        xp = xp[:, :, ::2, ::2, ::2]
        de = 1
        osz = lambda s: (s + 2 * padding - dilation * (k - 1) - 1) // 2 + 1
    else:
        de = dilation
        osz = lambda s: s + 2 * padding - dilation * (k - 1)

    do, ho, wo = osz(d), osz(h), osz(wsz)
    r = n * do * ho * wo

    # Tap-folded patch matrix: rows = (kd, kh, kw, cin), cols = (n, od, oh, ow).
    taps = []
    for kd in range(k):
        for kh in range(k):
            for kw in range(k):
                sl = xp[:, :, kd * de:kd * de + do,
                        kh * de:kh * de + ho,
                        kw * de:kw * de + wo]
                taps.append(jnp.transpose(sl, (1, 0, 2, 3, 4)).reshape(cin, r))
    p = jnp.concatenate(taps, axis=0) if len(taps) > 1 else taps[0]     # (K^3*Cin, R)
    wf = jnp.transpose(w, (0, 2, 3, 4, 1)).reshape(cout, k * k * k * cin)
    y = _matmul_cols(wf, p, b, relu=relu)                               # (Cout, R)
    y = y.reshape(cout, n, do, ho, wo)
    return jnp.transpose(y, (1, 0, 2, 3, 4))


def convtranspose3d_pallas(x, w, b):
    """ConvTranspose3d(kernel=2, stride=2). x: (N,Cin,D,H,W); w: (Cin,Cout,2,2,2)."""
    n, cin, d, h, wsz = x.shape
    cout = w.shape[1]
    p = jnp.transpose(x, (1, 0, 2, 3, 4)).reshape(cin, n * d * h * wsz).astype(jnp.bfloat16)
    wf = jnp.transpose(w, (2, 3, 4, 1, 0)).reshape(8 * cout, cin)       # rows = (a,b,c,co)
    b8 = jnp.tile(b, 8)
    y = _matmul_cols(wf, p, b8, relu=False)                             # (8*Cout, N*D*H*W)
    y = y.reshape(2, 2, 2, cout, n, d, h, wsz)
    y = jnp.transpose(y, (4, 3, 5, 0, 6, 1, 7, 2)).reshape(n, cout, 2 * d, 2 * h, 2 * wsz)
    return y


# ----------------------------------------------------------------------------
# Parameters (deterministic init, PyTorch shapes)
# ----------------------------------------------------------------------------
def init_params(key, in_channel, out_channel, kernel_size=3):
    keys = iter(jax.random.split(key, 128))

    def conv(cout, cin, k):
        lim = 1.0 / jnp.sqrt(float(cin * k ** 3))
        w = jax.random.uniform(next(keys), (cout, cin, k, k, k), jnp.float32, -lim, lim)
        bb = jax.random.uniform(next(keys), (cout,), jnp.float32, -lim, lim)
        return {"w": w, "b": bb}

    def convT(cin, cout):
        lim = 1.0 / jnp.sqrt(float(cout * 8))
        w = jax.random.uniform(next(keys), (cin, cout, 2, 2, 2), jnp.float32, -lim, lim)
        bb = jax.random.uniform(next(keys), (cout,), jnp.float32, -lim, lim)
        return {"w": w, "b": bb}

    k = kernel_size
    p = {}
    p["enc1"] = [conv(10, in_channel, k), conv(10, 10, k)]
    p["enc2"] = [conv(20, 10, k), conv(20, 20, k)]
    p["enc3"] = [conv(30, 20, k), conv(30, 30, k)]
    p["enc4"] = [conv(40, 30, k), conv(40, 40, k)]
    p["bottleneck"] = [conv(50, 40, k), conv(50, 50, k), convT(50, 40)]
    p["dec4"] = [conv(40, 80, k), conv(40, 40, k), convT(40, 30)]
    p["dec3"] = [conv(30, 60, k), conv(30, 30, k), convT(30, 20)]
    p["dec2"] = [conv(20, 40, k), conv(20, 20, k), convT(20, 10)]
    p["final"] = [conv(10, 20, k), conv(10, 10, k), conv(out_channel, 10, 1)]
    return p


# ----------------------------------------------------------------------------
# Forward pass (whole batch folded into the matmul column axis)
# ----------------------------------------------------------------------------
def forward(params, x, pad=1):
    c = conv3d_pallas

    # contracting_block_first
    e1 = c(x, params["enc1"][0]["w"], params["enc1"][0]["b"], padding=pad, dilation=1)
    e1 = c(e1, params["enc1"][1]["w"], params["enc1"][1]["b"], padding=pad, dilation=1)

    def contract(t, blk):
        t = c(t, blk[0]["w"], blk[0]["b"], padding=2, dilation=2, stride=2)
        t = c(t, blk[1]["w"], blk[1]["b"], padding=pad, dilation=1)
        return t

    e2 = contract(e1, params["enc2"])
    e3 = contract(e2, params["enc3"])
    e4 = contract(e3, params["enc4"])

    # bottleneck
    bn = c(e4, params["bottleneck"][0]["w"], params["bottleneck"][0]["b"],
           padding=pad, dilation=2)
    bn = c(bn, params["bottleneck"][1]["w"], params["bottleneck"][1]["b"],
           padding=pad, dilation=1)
    bn = convtranspose3d_pallas(bn, params["bottleneck"][2]["w"], params["bottleneck"][2]["b"])

    def expand(bridge, layer, blk):
        # center_crop in the reference discards the crop -> it is just cat([bridge, layer], ch)
        t = jnp.concatenate([bridge, layer], axis=1)
        t = c(t, blk[0]["w"], blk[0]["b"], padding=pad, dilation=1)
        t = c(t, blk[1]["w"], blk[1]["b"], padding=pad, dilation=1)
        return convtranspose3d_pallas(t, blk[2]["w"], blk[2]["b"])

    d4 = expand(e4, bn, params["dec4"])
    d3 = expand(e3, d4, params["dec3"])
    d2 = expand(e2, d3, params["dec2"])

    # final_block (the reference applies ReLU after the 1x1x1 conv as well)
    t = jnp.concatenate([e1, d2], axis=1)
    t = c(t, params["final"][0]["w"], params["final"][0]["b"], padding=pad, dilation=1)
    t = c(t, params["final"][1]["w"], params["final"][1]["b"], padding=pad, dilation=1)
    t = c(t, params["final"][2]["w"], params["final"][2]["b"], padding=0, dilation=1)
    return t


@functools.partial(jax.jit, static_argnames=("pad",))
def forward_ncdhw(params, x, pad=1):
    # x: (N, Cin, D, H, W) -> (N, Cout, D, H, W)
    return forward(params, x, pad=pad)


# ----------------------------------------------------------------------------
# Sanity checks of the building blocks vs. XLA reference (f32 vs bf16 kernel)
# ----------------------------------------------------------------------------
def _check_building_blocks(key):
    k1, k2, k3, k4, k5 = jax.random.split(key, 5)
    x = jax.random.normal(k1, (2, 4, 8, 8, 8), jnp.float32)
    w = jax.random.normal(k2, (6, 4, 3, 3, 3), jnp.float32) * 0.1
    b = jax.random.normal(k3, (6,), jnp.float32) * 0.1
    dn = ("NCDHW", "OIDHW", "NCDHW")

    def rel_err(a, r):
        return float(jnp.max(jnp.abs(a - r)) / (jnp.max(jnp.abs(r)) + 1e-6))

    # standard conv, pad=1, dilation=1, + ReLU
    y = conv3d_pallas(x, w, b, padding=1, dilation=1)
    ref = lax.conv_general_dilated(x, w, (1, 1, 1), [(1, 1)] * 3, dimension_numbers=dn)
    ref = jnp.maximum(ref + b[None, :, None, None, None], 0.0)
    assert rel_err(y, ref) < 2e-2, ("conv3d mismatch", rel_err(y, ref))

    # strided dilated conv (pad=2, stride=2, dilation=2) + ReLU
    y = conv3d_pallas(x, w, b, padding=2, dilation=2, stride=2)
    ref = lax.conv_general_dilated(x, w, (2, 2, 2), [(2, 2)] * 3,
                                   rhs_dilation=(2, 2, 2), dimension_numbers=dn)
    ref = jnp.maximum(ref + b[None, :, None, None, None], 0.0)
    assert rel_err(y, ref) < 2e-2, ("strided conv3d mismatch", rel_err(y, ref))

    # ConvTranspose3d(k=2, s=2)
    wt = jax.random.normal(k4, (4, 5, 2, 2, 2), jnp.float32) * 0.1
    bt = jax.random.normal(k5, (5,), jnp.float32) * 0.1
    y = convtranspose3d_pallas(x, wt, bt)
    ref = jnp.einsum("nidhw,ioabc->nodahbwc", x, wt).reshape(2, 5, 16, 16, 16)
    ref = ref + bt[None, :, None, None, None]
    assert rel_err(y, ref) < 2e-2, ("convtranspose3d mismatch", rel_err(y, ref))


if __name__ == "__main__":
    # Spatial size 32 is forced by the architecture (bottleneck needs D/8 - 2 > 0
    # and 2*(D/8 - 2) == D/8  =>  D = 32).
    B, IN_CH, OUT_CH, S = 2, 4, 3, 32
    key = jax.random.PRNGKey(0)
    kp, kx, kc = jax.random.split(key, 3)

    _check_building_blocks(kc)

    params = init_params(kp, IN_CH, OUT_CH, kernel_size=3)
    x = jax.random.normal(kx, (B, IN_CH, S, S, S), jnp.float32)

    out = forward_ncdhw(params, x, pad=1)
    out = jax.block_until_ready(out)
    assert out.shape == (B, OUT_CH, S, S, S), out.shape
    assert bool(jnp.all(jnp.isfinite(out)))
    print("KERNEL_OK")
</pallas_src>

<mosaic_0001>
module attributes {stable_mosaic.version = 11 : i64} {
  func.func @_matmul_bias_act_kernel(%arg0: i32, %arg1: memref<6x108xbf16, #tpu.memory_space<vmem>>, %arg2: memref<108x512xbf16, #tpu.memory_space<vmem>>, %arg3: memref<6x1xf32, #tpu.memory_space<vmem>>, %arg4: memref<6x512xf32, #tpu.memory_space<vmem>>) attributes {dimension_semantics = [#tpu.dimension_semantics<parallel>], iteration_bounds = array<i64: 2>, scalar_prefetch = 0 : i64, scratch_operands = 0 : i64, tpu.core_type = #tpu.core_type<tc>, window_params = [{pipeline_mode = #tpu.pipeline_mode<synchronous>, transform_indices = @transform_0, window_bounds = array<i64: 6, 108>}, {transform_indices = @transform_1, window_bounds = array<i64: 108, 512>}, {pipeline_mode = #tpu.pipeline_mode<synchronous>, transform_indices = @transform_2, window_bounds = array<i64: 6, 1>}, {transform_indices = @transform_3, window_bounds = array<i64: 6, 512>}]} {
    %c0 = arith.constant 0 : index
    %c0_0 = arith.constant 0 : index
    %0 = vector.load %arg1[%c0, %c0_0] : memref<6x108xbf16, #tpu.memory_space<vmem>>, vector<6x108xbf16>
    %c0_1 = arith.constant 0 : index
    %c0_2 = arith.constant 0 : index
    %1 = vector.load %arg2[%c0_1, %c0_2] : memref<108x512xbf16, #tpu.memory_space<vmem>>, vector<108x512xbf16>
    %cst = arith.constant dense<0.000000e+00> : vector<6x512xf32>
    %2 = tpu.matmul %0, %1, %cst {dimension_numbers = #tpu.dot_dimension_numbers<[1], [0], [0], [1], [0, 0, 1, 1], [], []>} : vector<6x108xbf16>, vector<108x512xbf16>, vector<6x512xf32> -> vector<6x512xf32>
    %c0_3 = arith.constant 0 : index
    %c0_4 = arith.constant 0 : index
    %3 = vector.load %arg3[%c0_3, %c0_4] : memref<6x1xf32, #tpu.memory_space<vmem>>, vector<6x1xf32>
    %4 = vector.broadcast %3 : vector<6x1xf32> to vector<6x512xf32>
    %5 = arith.addf %2, %4 : vector<6x512xf32>
    %cst_5 = arith.constant 0.000000e+00 : f32
    %6 = vector.broadcast %cst_5 : f32 to vector<6x512xf32>
    %7 = arith.maximumf %5, %6 : vector<6x512xf32>
    %c0_6 = arith.constant 0 : index
    %c0_7 = arith.constant 0 : index
    %8 = vector.load %arg4[%c0_6, %c0_7] : memref<6x512xf32, #tpu.memory_space<vmem>>, vector<6x512xf32>
    tpu.vector_store %arg4[%c0_6, %c0_7], %7 {strides = array<i32>} : memref<6x512xf32, #tpu.memory_space<vmem>>, vector<6x512xf32>,
    return
  }
  func.func @transform_0(%arg0: i32) -> (i32, i32) {
    %c0_i32 = arith.constant 0 : i32
    %c0_i32_0 = arith.constant 0 : i32
    %c0_i32_1 = arith.constant 0 : i32
    return %c0_i32, %c0_i32_0 : i32, i32
  }
  func.func @transform_1(%arg0: i32) -> (i32, i32) {
    %c0_i32 = arith.constant 0 : i32
    %c0_i32_0 = arith.constant 0 : i32
    return %c0_i32, %arg0 : i32, i32
  }
  func.func @transform_2(%arg0: i32) -> (i32, i32) {
    %c0_i32 = arith.constant 0 : i32
    %c0_i32_0 = arith.constant 0 : i32
    %c0_i32_1 = arith.constant 0 : i32
    return %c0_i32, %c0_i32_0 : i32, i32
  }
  func.func @transform_3(%arg0: i32) -> (i32, i32) {
    %c0_i32 = arith.constant 0 : i32
    %c0_i32_0 = arith.constant 0 : i32
    return %c0_i32, %arg0 : i32, i32
  }
}

</mosaic_0001>

<bundles_post_ra>
// kernel: tpu_custom_call.1
= control target key start
LH: loop header
LB: loop body
LE: loop exit
PB: predicated region body
PF: predicated region fallthrough
CT: control target
= control target key end

     0   :  { %8 = vsyncpa [#allocation3], 0  ;;  %s1050_s0 = inlined_call_operand.vmem [shape: bf16[6,108], index: 0, kind: input, shape index: {}]   ;;  %s1051_s1 = inlined_call_operand.hbm [shape: bf16[108,1024], index: 1, kind: input, shape index: {}]   ;;  %s1052_s2 = inlined_call_operand.vmem [shape: f32[6,1], index: 2, kind: input, shape index: {}]   ;;  %s1053_s3 = inlined_call_operand.hbm [shape: f32[6,1024], index: 3, kind: output, shape index: {}]  }
   0x1   :  { %10 = vsyncpa [#allocation3 + $0x1], 0 }
   0x2   :  { %11 = vsyncpa [#allocation4], 0 }
   0x3   :  { %13 = vsyncpa [#allocation4 + $0x1], 0  ;;  %s862_s12 = smov 0   ;;  %s864_s13 = smov 0  }
   0x4   :  { %s866_s14 = smov 0   ;;  %s868_s15 = smov 0  }
   0x5 LB: > { %s883_s16 = sadd.s32 4294967295, %s836_s15   ;;  %s529_s17 = sadd.s32 4294967294, %s836_s15   ;;  %s836_s15 = sphi %s868_s15, %s1061_s15   ;;  %s832_s14 = sphi %s866_s14, %s1060_s14   ;;  %s828_s13 = sphi %s864_s13, %s1059_s13   ;;  %s824_s12 = sphi %s862_s12, %s1058_s12  }
   0x6   : > { %s887_s18 = sadd.s32 1, %s836_s15   ;;  %s47_s19 = sadd.s32 1, %s832_s14 }
   0x7   : > { %s44_s20 = ssub.s32 %s836_s15, %s887_s18  ;;  %p54_p0 = scmp.ne.s32.totalorder %s832_s14, %s828_s13 }
   0x8   : > { %p45_p1 = scmp.eq.s32.totalorder %s44_s20, 0  ;;  %p55_p2 = scmp.eq.s32.totalorder %s836_s15, 0 }
   0x9   : > { %p60_p3 = scmp.ne.s32.totalorder %s828_s13, %s824_s12  ;;  %p61_p4 = scmp.eq.s32.totalorder %s883_s16, 0 }
   0xa   : > { %s899_s21 = scalar_select %p45_p1, %s832_s14, %s47_s19  }
   0xb   : > { %p56_p5 = por %p55_p2, %p54_p0  ;;  %p901_p6 = por %p61_p4, %p60_p3 }
   0xc   : > { %p105_p7 = scmp.eq.s32.totalorder %s883_s16, 1  ;;  %p111_p8 = scmp.eq.s32.totalorder %s529_s17, 1 }
   0xd   : > { %p531_p9 = scmp.ge.s32.totalorder %s836_s15, 2  ;;  %p701_p10 = scmp.lt.s32.totalorder %s836_s15, 2 }
   0xe   : > { %p908_p11 = por %p105_p7, %p54_p0  ;;  %p912_p12 = por %p111_p8, %p60_p3 }
   0xf   : > { %s137_s25 = sand.u32 1, %s832_s14   ;;  %s657_s26 = sshll.u32 %s836_s15, 4 }
  0x10   : > { %s687_s27 = smul.u32 224, %s137_s25  ;;  %s146_s30 = scalar_lea.hbm %s1051_s1, %s657_s26 }
  0x11   : > { %p921_p13 = pnand %p701_p10, %p56_p5  ;;  %s147_s5 = sshll.u32 %s146_s30, 4  ;;  %s148_s5 = int_to_ptr.hbm [resolvable:$true] %s147_s5 }
  0x12   : > { %s141_s6 = scalar_lea.vmem [#allocation2], %s687_s27  ;;  %p534_p0 = scmp.ge.s32.totalorder %s836_s15, 1 }
  0x13   : > { %s149_s7 = sshll.u32 %s141_s6, 4  ;;  %s138_s8 = scalar_lea.sflag [#allocation3], %s137_s25  ;;  %s150_s7 = int_to_ptr.vmem [resolvable:$true] %s149_s7 }
  0x14   : > { %s740_s9 = sshra.s32 %s148_s5, 4  ;;  %p744_p2 = pneg %p921_p13  ;;  %s741_s9 = int_to_ptr.hbm [resolvable:$true] %s740_s9 }
  0x15   : > { %s742_s10 = scalar_lea.hbm %s741_s9, 224  ;;  %s747_s19 = scalar_lea.hbm %s1051_s1, 448 }
  0x16   : > { %p743_p1 = scmp.ne.s32.totalorder %s741_s9, %s742_s10  ;;  %p748_p5 = scmp.lt.s32.totalorder %s741_s9, %s1051_s1 }
  0x17   : > { %p749_p7 = scmp.lt.s32.totalorder %s747_s19, %s742_s10 }
  0x18   : > { %p745_p3 = pnand %p744_p2, %p743_p1 }
  0x19   : > { %p750_p8 = por %p749_p7, %p748_p5 }
  0x1a   : > { %p746_p4 = pneg %p745_p3 }
  0x1c   : > { %p751_p10 = pnand %p750_p8, %p746_p4 }
  0x1e   : > { %754 = shalt.err (!%p751_p10)
}
  0x1f   : > { %s838_s25 = smov 512   ;;  %s839_s27 = smov 256  }
  0x20   : > { %s840_s28 = smov 16   ;;  %p157_p1 = scmp.lt.s32.totalorder %s836_s15, 3 }
  0x21   : > { %696 = dma.hbm_to_vmem [thread:$0]  (!%p921_p13), %s148_s5, 3584, %s150_s7, %s138_s8, %s838_s25, %s839_s27, %s840_s28  }
  0x22   : > { %p158_p2 = pnand %p534_p0, %p157_p1 }
  0x23   : > { %s940_s29 = sand.u32 (!%p158_p2), 1, %s828_s13  }
  0x24   : > { %161 = sbr.rel (%p158_p2) target bundleno = 215 (0xd7), region = 32  ;;  %s164_s6 = scalar_lea.sflag (!%p158_p2), [#allocation3], %s940_s29 }
  0x25   : > { %s688_s30 = smul.u32 (!%p158_p2), 224, %s940_s29 }
  0x27   : > { %s944_s9 = scalar_lea.vmem (!%p158_p2), [#allocation2], %s688_s30 }
  0x29   : > { %815 = dma.done.wait (%p901_p6), %s164_s6, 3584  }
  0x2a   : > { %817 = vsyncadd (%p901_p6), %s164_s6, 4294963712  ;;  %vm369_vm0 = vcmask 1045504   ;;  %v634_v0 = vld [vmem:[%s944_s9 + $0xc0] sm:$0xf]  ;;  %v684_v1 = vld [vmem:[%s944_s9 + $0xcc] sm:$0x30] }
  0x2b   : > { %v682_v2 = vld [vmem:[%s944_s9 + $0xc4] sm:$0xf]  ;;  %v635_v3 = vor.u32 %v684_v1, %v634_v0  ;;  %v636_v4 = vld [vmem:[%s944_s9 + $0xd0] sm:$0x30]  ;;  %v642_v5 = vld [vmem:[%s944_s9 + $0xc8] sm:$0xf] }
  0x2c   : > { %v685_v6 = vld [vmem:[%s944_s9 + $0xd4] sm:$0x30]  ;;  %v639_v7 = vor.u32 %v682_v2, %v636_v4  ;;  %v683_v9 = vld [vmem:[%s944_s9 + $0xcc] sm:$0xf]  ;;  %v644_v10 = vld [vmem:[%s944_s9 + $0xd8] sm:$0x30] }
  0x2d   : > { %v643_v8 = vor.u32 %v685_v6, %v642_v5  ;;  %v618_v11 = vld [vmem:[%s944_s9 + $0xa0] sm:$0xf]  ;;  %v371_v12 = vsel %vm369_vm0, %v635_v3, 0  ;;  %v647_v13 = vor.u32 %v683_v9, %v644_v10  ;;  %v680_v14 = vld [vmem:[%s944_s9 + $0xac] sm:$0xf0]  ;;  %v841_v21 = vmov 0  }
  0x2e   : > { %v678_v15 = vld [vmem:[%s944_s9 + $0xa4] sm:$0xf]  ;;  %383 = vmatpush.bf16.msra.mxu0 %v371_v12  ;;  %v374_v16 = vsel %vm369_vm0, %v639_v7, 0  ;;  %v619_v18 = vor.u32 %v680_v14, %v618_v11  ;;  %v620_v19 = vld [vmem:[%s944_s9 + $0xb0] sm:$0xf0]  ;;  %739 = vset.pattern.permute.xlu0 %v841_v21  ;;  %vm365_vm1 = vcmask 883712  }
  0x2f   : > { %v377_v17 = vsel %vm369_vm0, %v643_v8, 0  ;;  %v626_v20 = vld [vmem:[%s944_s9 + $0xa8] sm:$0xf]  ;;  %396 = vmatpush.bf16.msra.mxu1 %v374_v16  ;;  %v380_v22 = vsel %vm369_vm0, %v647_v13, 0  ;;  %v623_v23 = vor.u32 %v678_v15, %v620_v19  ;;  %v681_v24 = vld [vmem:[%s944_s9 + $0xb4] sm:$0xf0] }
  0x30   : > { %409 = vmatpush.bf16.msra.mxu2 %v377_v17  ;;  %v679_v25 = vld [vmem:[%s944_s9 + $0xac] sm:$0xf]  ;;  %422 = vmatpush.bf16.msra.mxu3 %v380_v22  ;;  %v627_v26 = vor.u32 %v681_v24, %v626_v20  ;;  %v628_v27 = vld [vmem:[%s944_s9 + $0xb8] sm:$0xf0]  ;;  %v602_v28 = vld [vmem:[%s944_s9 + $0x80] sm:$0xf] }
  0x31   : > { %v676_v29 = vld [vmem:[%s944_s9 + $0x8c] sm:$0xf0]  ;;  %v631_v30 = vor.u32 %v679_v25, %v628_v27  ;;  %v674_v31 = vld [vmem:[%s944_s9 + $0x84] sm:$0xf]  ;;  %v604_v32 = vld [vmem:[%s944_s9 + $0x90] sm:$0xf0] }
  0x32   : > { %v610_v33 = vld [vmem:[%s944_s9 + $0x88] sm:$0xf]  ;;  %384 = vmatpush.bf16.msra.mxu0 %v619_v18  ;;  %v603_v34 = vor.u32 %v676_v29, %v602_v28  ;;  %v677_v35 = vld [vmem:[%s944_s9 + $0x94] sm:$0xf0]  ;;  %v675_v36 = vld [vmem:[%s944_s9 + $0x8c] sm:$0xf]  ;;  %v607_v38 = vor.u32 %v674_v31, %v604_v32 }
  0x33   : > { %v612_v37 = vld [vmem:[%s944_s9 + $0x98] sm:$0xf0]  ;;  %397 = vmatpush.bf16.msra.mxu1 %v623_v23  ;;  %v611_v39 = vor.u32 %v677_v35, %v610_v33  ;;  %v586_v40 = vld [vmem:[%s944_s9 + $0x60] sm:$0xf]  ;;  %v672_v41 = vld [vmem:[%s944_s9 + $0x6c] sm:$0xf0] }
  0x34   : > { %410 = vmatpush.bf16.msra.mxu2 %v627_v26  ;;  %v670_v42 = vld [vmem:[%s944_s9 + $0x64] sm:$0xf]  ;;  %423 = vmatpush.bf16.msra.mxu3 %v631_v30  ;;  %v615_v43 = vor.u32 %v675_v36, %v612_v37  ;;  %v588_v44 = vld [vmem:[%s944_s9 + $0x70] sm:$0xf0]  ;;  %v594_v45 = vld [vmem:[%s944_s9 + $0x68] sm:$0xf]  ;;  %v587_v49 = vor.u32 %v672_v41, %v586_v40 }
  0x35   : > { %v673_v46 = vld [vmem:[%s944_s9 + $0x74] sm:$0xf0]  ;;  %v671_v47 = vld [vmem:[%s944_s9 + $0x6c] sm:$0xf]  ;;  %v596_v48 = vld [vmem:[%s944_s9 + $0x78] sm:$0xf0]  ;;  %v591_v50 = vor.u32 %v670_v42, %v588_v44 }
  0x36   : > { %385 = vmatpush.bf16.msra.mxu0 %v603_v34  ;;  %v595_v51 = vor.u32 %v673_v46, %v594_v45  ;;  %v570_v52 = vld [vmem:[%s944_s9 + $0x40] sm:$0xf]  ;;  %v668_v53 = vld [vmem:[%s944_s9 + $0x4c] sm:$0xf0]  ;;  %v666_v54 = vld [vmem:[%s944_s9 + $0x44] sm:$0xf]  ;;  %v599_v55 = vor.u32 %v671_v47, %v596_v48 }
  0x37   : > { %398 = vmatpush.bf16.msra.mxu1 %v607_v38  ;;  %v572_v56 = vld [vmem:[%s944_s9 + $0x50] sm:$0xf0]  ;;  %v578_v57 = vld [vmem:[%s944_s9 + $0x48] sm:$0xf]  ;;  %v669_v58 = vld [vmem:[%s944_s9 + $0x54] sm:$0xf0]  ;;  %v571_v61 = vor.u32 %v668_v53, %v570_v52 }
  0x38   : > { %411 = vmatpush.bf16.msra.mxu2 %v611_v39  ;;  %424 = vmatpush.bf16.msra.mxu3 %v615_v43  ;;  %v667_v59 = vld [vmem:[%s944_s9 + $0x4c] sm:$0xf]  ;;  %v580_v60 = vld [vmem:[%s944_s9 + $0x58] sm:$0xf0]  ;;  %v575_v62 = vor.u32 %v666_v54, %v572_v56  ;;  %v579_v63 = vor.u32 %v669_v58, %v578_v57  ;;  %v554_v0 = vld [vmem:[%s944_s9 + $0x20] sm:$0xf] }
  0x39   : > { %v664_v1 = vld [vmem:[%s944_s9 + $0x2c] sm:$0xf0]  ;;  %v662_v2 = vld [vmem:[%s944_s9 + $0x24] sm:$0xf]  ;;  %v583_v3 = vor.u32 %v667_v59, %v580_v60  ;;  %v556_v4 = vld [vmem:[%s944_s9 + $0x30] sm:$0xf0] }
  0x3a   : > { %386 = vmatpush.bf16.msra.mxu0 %v587_v49  ;;  %v562_v5 = vld [vmem:[%s944_s9 + $0x28] sm:$0xf]  ;;  %v665_v6 = vld [vmem:[%s944_s9 + $0x34] sm:$0xf0]  ;;  %v663_v7 = vld [vmem:[%s944_s9 + $0x2c] sm:$0xf]  ;;  %v555_v9 = vor.u32 %v664_v1, %v554_v0  ;;  %v559_v11 = vor.u32 %v662_v2, %v556_v4 }
  0x3b   : > { %399 = vmatpush.bf16.msra.mxu1 %v591_v50  ;;  %v564_v8 = vld [vmem:[%s944_s9 + $0x38] sm:$0xf0]  ;;  %v223_v10 = vld [vmem:[%s1052_s2] sm:$0x3f]  ;;  %v563_v12 = vor.u32 %v665_v6, %v562_v5  ;;  %v660_v14 = vld [vmem:[%s944_s9 + $0xc] sm:$0xf0] }
  0x3c   : > { %412 = vmatpush.bf16.msra.mxu2 %v595_v51  ;;  %425 = vmatpush.bf16.msra.mxu3 %v599_v55  ;;  %v538_v13 = vld [vmem:[%s944_s9] sm:$0xf]  ;;  %v658_v15 = vld [vmem:[%s944_s9 + $0x4] sm:$0xf]  ;;  %v567_v16 = vor.u32 %v663_v7, %v564_v8  ;;  %v540_v17 = vld [vmem:[%s944_s9 + $0x10] sm:$0xf0] }
  0x3d   : > { %v546_v18 = vld [vmem:[%s944_s9 + $0x8] sm:$0xf]  ;;  %v661_v19 = vld [vmem:[%s944_s9 + $0x14] sm:$0xf0]  ;;  %226 = vperm.xlu0 %739, %v223_v10   ;;  %v659_v20 = vld [vmem:[%s944_s9 + $0xc] sm:$0xf]  ;;  %v539_v22 = vor.u32 %v660_v14, %v538_v13  ;;  %v543_v23 = vor.u32 %v658_v15, %v540_v17 }
  0x3e   : > { %387 = vmatpush.bf16.msra.mxu0 %v571_v61  ;;  %v548_v21 = vld [vmem:[%s944_s9 + $0x18] sm:$0xf0]  ;;  %v547_v24 = vor.u32 %v661_v19, %v546_v18  ;;  %v194_v26 = vld [vmem:[%s1050_s0] sm:$0x7]  ;;  %s535_s8 = sshll.u32 %s940_s29, 5  ;;  %s686_s10 = sshll.u32 %s883_s16, 5 }
  0x3f   : > { %400 = vmatpush.bf16.msra.mxu1 %v575_v62  ;;  %v551_v25 = vor.u32 %v659_v20, %v548_v21  ;;  %s190_s11 = scalar_lea.vmem [#allocation5], %s535_s8  ;;  %s454_s20 = scalar_lea.hbm %s1053_s3, %s686_s10 }
  0x40   : > { %413 = vmatpush.bf16.msra.mxu2 %v579_v63  ;;  %426 = vmatpush.bf16.msra.mxu3 %v583_v3  ;;  %s456_s26 = sshll.u32 %s190_s11, 4  ;;  %s458_s25 = sshll.u32 %s454_s20, 4  ;;  %s457_s26 = int_to_ptr.vmem [resolvable:$true] %s456_s26  ;;  %s459_s25 = int_to_ptr.hbm [resolvable:$true] %s458_s25 }
  0x41   : > { %s443_s16 = scalar_lea.sflag [#allocation4], %s940_s29  ;;  %s784_s27 = sshra.s32 %s459_s25, 4  ;;  %s785_s27 = int_to_ptr.hbm [resolvable:$true] %s784_s27 }
  0x42   : > { %388 = vmatpush.bf16.msra.mxu0 %v555_v9  ;;  %s786_s28 = scalar_lea.hbm %s785_s27, 32  ;;  %s790_s9 = scalar_lea.hbm %s1053_s3, 64 }
  0x43   : > { %401 = vmatpush.bf16.msra.mxu1 %v559_v11  ;;  %p787_p6 = scmp.ne.s32.totalorder %s785_s27, %s786_s28  ;;  %p791_p3 = scmp.lt.s32.totalorder %s785_s27, %s1053_s3 }
  0x44   : > { %414 = vmatpush.bf16.msra.mxu2 %v563_v12  ;;  %427 = vmatpush.bf16.msra.mxu3 %v567_v16  ;;  %p792_p4 = scmp.lt.s32.totalorder %s790_s9, %s786_s28 }
  0x45   : > { %p788_p13 = pnand %p787_p6, %p908_p11 }
  0x46   : > { %389 = vmatpush.bf16.msra.mxu0 %v539_v22  ;;  %p793_p5 = por %p792_p4, %p791_p3 }
  0x47   : > { %402 = vmatpush.bf16.msra.mxu1 %v543_v23  ;;  %p789_p0 = pneg %p788_p13 }
  0x48   : > { %415 = vmatpush.bf16.msra.mxu2 %v547_v24  ;;  %428 = vmatpush.bf16.msra.mxu3 %v551_v25 }
  0x49   : > { %648 = vmatmul.msk.bf16.vlgmr.msra.gmra.mxu0 %vm365_vm1, %v194_v26  ;;  %p794_p7 = pnand %p793_p5, %p789_p0 }
  0x4a   : > { %649 = vmatmul.msk.bf16.vlgmr.msra.gmra.mxu1 %vm365_vm1, %v194_v26 }
  0x4b   : > { %650 = vmatmul.msk.bf16.vlgmr.msra.gmra.mxu2 %vm365_vm1, %v194_v26  ;;  %651 = vmatmul.msk.bf16.vlgmr.msra.gmra.mxu3 %vm365_vm1, %v194_v26 }
  0xaf   : > { %v227_v27 = vpop.permute.xlu0 %226 }
  0xc6   : > { %v391_v28 = vpop.f32.mrf.mxu0 }
  0xc7   : > { %v404_v29 = vpop.f32.mrf.mxu1  ;;  %v392_v30 = vadd.f32 %v391_v28, %v227_v27 }
  0xc8   : > { %v405_v31 = vadd.f32 %v404_v29, %v227_v27 }
  0xc9   : > { %v434_v32 = vmax.f32 %v392_v30, 0.0 }
  0xca   : > { %v435_v33 = vmax.f32 %v405_v31, 0.0 }
  0xcb   : > { %438 = vst [vmem:[%s190_s11] sm:$0x3f] %v434_v32 }
  0xcc   : > { %439 = vst [vmem:[%s190_s11 + $0x8] sm:$0x3f] %v435_v33 }
  0xce   : > { %v417_v34 = vpop.f32.mrf.mxu2  ;;  %v430_v36 = vpop.f32.mrf.mxu3 }
  0xcf   : > { %v418_v35 = vadd.f32 %v417_v34, %v227_v27  ;;  %v393_v37 = vpop.f32.mrf.mxu0  ;;  %v431_v38 = vadd.f32 %v430_v36, %v227_v27  ;;  %v406_v39 = vpop.f32.mrf.mxu1 }
  0xd1   : > { %v436_v40 = vmax.f32 %v418_v35, 0.0  ;;  %v437_v41 = vmax.f32 %v431_v38, 0.0 }
  0xd3   : > { %440 = vst [vmem:[%s190_s11 + $0x10] sm:$0x3f] %v436_v40 }
  0xd4   : > { %441 = vst [vmem:[%s190_s11 + $0x18] sm:$0x3f] %v437_v41 }
  0xd5   : > { %797 = shalt.err (!%p794_p7)
}
  0xd6   : > { %691 = dma.vmem_to_hbm [thread:$0]  (%p908_p11), %s457_s26, 512, %s459_s25, %s443_s16   ;;  %v419_v42 = vpop.f32.mrf.mxu2  ;;  %v432_v43 = vpop.f32.mrf.mxu3 }
  0xd7 PF: > { %s470_s29 = sand.u32 1, %s824_s12   ;;  %p698_p8 = pnand %p531_p9, %p912_p12 }
  0xd8   : > { %s471_s5 = scalar_lea.sflag [#allocation4], %s470_s29 }
  0xd9   : > { %p699_p10 = pneg %p698_p8 }
  0xdb   : > { %819 = dma.done.wait (%p699_p10), %s471_s5, 512  }
  0xdc   : > { %821 = vsyncadd (%p699_p10), %s471_s5, 4294966784  ;;  %p16_p11 = scmp.ge.s32.totalorder %s887_s18, 4   ;;  %s1058_s12 = smov %s828_s13 }
  0xdd   : > { %s1059_s13 = smov %s832_s14  ;;  %s1060_s14 = smov %s899_s21 }
  0xde   : > { %s1061_s15 = smov %s887_s18  ;;  %18 = sbr.rel (!%p16_p11) target bundleno = 5 (0x5), region = 77 }
  0xe3   :  { %477 = vsyncpa [#allocation3], 1 }
  0xe4   :  { %479 = vsyncpa [#allocation3 + $0x1], 1 }
  0xe5   :  { %480 = vsyncpa [#allocation4], 1 }
  0xe6   :  { %482 = vsyncpa [#allocation4 + $0x1], 1 }

</bundles_post_ra>
